<compile_context>
chip_gen: v6e
topology: v6e:2x2x1
jax: 0.10.0
libtpu: 0.0.40
codegen_flags: <defaults>
</compile_context>

<pallas_src>
import functools

import jax
import jax.numpy as jnp
from jax.experimental import pallas as pl
from jax.experimental.pallas import tpu as pltpu

EPS = 1e-8
LANE = 128


def _round_up(n, m):
    return ((n + m - 1) // m) * m


def _cdiv(a, b):
    return -(-a // b)


# ----------------------------- fused kernel ----------------------------------

def _make_fused_kernel(num_blocks, real_dims, num_classes, batch_actual, tile_b):
    """real_dims = (input_size, hidden_1, ..., hidden_n) -- un-padded feature counts."""

    def kernel(*refs):
        x_ref = refs[0]                                  # (tile_b, in_dim)     f32
        labels_ref = refs[1]                             # (tile_b, 1)          i32
        wb_refs = refs[2:2 + 2 * num_blocks]             # w_i (Din,Dout), b_i (1,Dout)
        wc_ref = refs[2 + 2 * num_blocks]                # (H_pad, C_pad)
        part_ref = refs[3 + 2 * num_blocks]              # (1, 8, LANE) per-tile partials

        step = pl.program_id(0)

        # ---- input layer norm (mean over the REAL feature count)
        x = x_ref[...]
        ms = jnp.sum(x * x, axis=-1, keepdims=True) * jnp.float32(1.0 / real_dims[0])
        x = x * pl.reciprocal(jnp.sqrt(ms) + EPS)

        # ---- FF blocks: Linear -> ReLU (ReLU_full_grad fwd == clamp(min=0)) -> norm
        #      (the torch forward uses block[0] of every block; those are exactly
        #       the weights materialized here). Activations stay in vregs/VMEM.
        for bi in range(num_blocks):
            w = wb_refs[2 * bi][...]
            b = wb_refs[2 * bi + 1][...]                 # (1, Dout) broadcast over rows
            h = jnp.dot(x, w, preferred_element_type=jnp.float32) + b
            h = jnp.maximum(h, 0.0)
            ms = jnp.sum(h * h, axis=-1, keepdims=True) * jnp.float32(
                1.0 / real_dims[bi + 1])
            x = h * pl.reciprocal(jnp.sqrt(ms) + EPS)

        # ---- classifier (no bias) + shift-by-max + CE + top-1 correctness
        logits = jnp.dot(x, wc_ref[...], preferred_element_type=jnp.float32)
        c_pad = logits.shape[-1]
        class_iota = jax.lax.broadcasted_iota(jnp.int32, logits.shape, 1)
        # mask padded class columns so they never win the max / contribute to softmax
        logits = jnp.where(class_iota < num_classes, logits, jnp.float32(-1e30))
        row_max = jnp.max(logits, axis=-1, keepdims=True)     # single XLU reduction
        shifted = logits - row_max                            # valid-class max is now 0
        lse = jnp.log(jnp.sum(jnp.exp(shifted), axis=-1, keepdims=True))
        labels = labels_ref[...]                              # (tile_b, 1) int32
        tgt = jnp.sum(jnp.where(class_iota == labels, shifted, 0.0),
                      axis=-1, keepdims=True)
        per_loss = lse - tgt                                  # (tile_b, 1)

        # argmax (first index achieving the max): after the shift the max is 0
        pred = jnp.min(jnp.where(shifted >= 0.0, class_iota, c_pad),
                       axis=-1, keepdims=True)
        per_correct = (pred == labels).astype(jnp.float32)

        # ---- mask batch-padding rows; emit lane-dense per-tile partial sums
        #      (loss in lane 0, correct count in lane 1).  Each step owns its own
        #      output block -> the grid axis is safely "parallel" (v7x 2nd core).
        row = jax.lax.broadcasted_iota(jnp.int32, (tile_b, 1), 0) + step * tile_b
        valid = (row < batch_actual).astype(jnp.float32)
        loss_sum = jnp.sum(per_loss * valid)
        corr_sum = jnp.sum(per_correct * valid)

        lane = jax.lax.broadcasted_iota(jnp.int32, part_ref.shape, 2)
        part_ref[...] = jnp.where(lane == 0, loss_sum,
                                  jnp.where(lane == 1, corr_sum, jnp.float32(0.0)))

    return kernel


# ----------------------------- params ----------------------------------------

def init_params(key, input_size, hidden_dims, num_classes):
    """Faithful to _init_weights: He init (std=sqrt(2)/sqrt(fan_in)), zero bias,
    zero classifier weight.  Weights stored as [in, out] so the kernel runs x @ W."""
    params = {"blocks": []}
    prev = input_size
    for h in hidden_dims:
        key, sub = jax.random.split(key)
        std = jnp.sqrt(2.0) / jnp.sqrt(prev)
        w = std * jax.random.normal(sub, (prev, h), dtype=jnp.float32)
        b = jnp.zeros((1, h), dtype=jnp.float32)
        params["blocks"].append((w, b))
        prev = h
    params["cls"] = jnp.zeros((prev, num_classes), dtype=jnp.float32)
    return params


def pad_params(params, num_classes):
    """Pad weights to lane-dense shapes ONCE (cache the result; do not re-pad per
    forward call).  Hidden/class dims are padded to 128 lanes; the input feature
    dim is left at its real width (x is not feature-padded either)."""
    blocks = params["blocks"]
    real_dims = [blocks[0][0].shape[0]] + [w.shape[1] for (w, _) in blocks]
    pad_dims = [real_dims[0]] + [_round_up(d, LANE) for d in real_dims[1:]]
    c_pad = _round_up(num_classes, LANE)

    flat = []
    for bi, (w, b) in enumerate(blocks):
        w_p = jnp.pad(w.astype(jnp.float32),
                      ((0, pad_dims[bi] - w.shape[0]),
                       (0, pad_dims[bi + 1] - w.shape[1])))
        b_p = jnp.pad(b.astype(jnp.float32).reshape(1, -1),
                      ((0, 0), (0, pad_dims[bi + 1] - w.shape[1])))
        flat += [w_p, b_p]
    wc_p = jnp.pad(params["cls"].astype(jnp.float32),
                   ((0, pad_dims[-1] - params["cls"].shape[0]),
                    (0, c_pad - num_classes)))
    flat.append(wc_p)
    return tuple(real_dims), tuple(flat)


# ----------------------------- wrapper ---------------------------------------

@functools.partial(jax.jit, static_argnames=("real_dims", "num_classes", "tile_b"))
def ff_model_forward(sample, class_labels, padded_weights, *, real_dims, num_classes,
                     tile_b=1024):
    num_blocks = len(real_dims) - 1
    bsz = sample.shape[0]
    x = sample.reshape(bsz, -1).astype(jnp.float32)      # reshape glue (fused by XLA)
    in_dim = x.shape[1]
    assert in_dim == real_dims[0]

    # tile selection that minimizes batch padding
    num_tiles = _cdiv(bsz, tile_b)
    tb = _round_up(_cdiv(bsz, num_tiles), 8)             # fp32 sublane multiple
    b_pad = num_tiles * tb

    # minimal wrapper-side copies: batch-row pad only (no feature padding of x)
    x_p = jnp.pad(x, ((0, b_pad - bsz), (0, 0)))
    labels_p = jnp.pad(class_labels.astype(jnp.int32), (0, b_pad - bsz)).reshape(b_pad, 1)

    block_ws = padded_weights[:2 * num_blocks]
    wc_p = padded_weights[2 * num_blocks]

    # BlockSpecs: batch-tiled x / labels; weights resident across the grid.
    in_specs = [pl.BlockSpec((tb, in_dim), lambda i: (i, 0)),
                pl.BlockSpec((tb, 1), lambda i: (i, 0))]
    for arr in block_ws:
        in_specs.append(pl.BlockSpec(arr.shape, lambda i: (0, 0)))
    in_specs.append(pl.BlockSpec(wc_p.shape, lambda i: (0, 0)))

    # lane-dense per-tile partial outputs: loss sum in lane 0, correct count in lane 1
    out_specs = pl.BlockSpec((1, 8, LANE), lambda i: (i, 0, 0))
    out_shape = jax.ShapeDtypeStruct((num_tiles, 8, LANE), jnp.float32)

    pd = [in_dim] + [block_ws[2 * k].shape[1] for k in range(num_blocks)]
    c_pad = wc_p.shape[1]
    flops = 2 * b_pad * (sum(pd[k] * pd[k + 1] for k in range(num_blocks))
                         + pd[-1] * c_pad)
    bytes_accessed = 4 * (int(x_p.size) + int(labels_p.size)
                          + sum(int(a.size) for a in padded_weights)
                          + num_tiles * 8 * LANE)
    transcendentals = b_pad * (num_blocks + 2 + c_pad)    # sqrt per norm, exp, log

    kernel = _make_fused_kernel(num_blocks, tuple(real_dims), num_classes, bsz, tb)

    partials = pl.pallas_call(
        kernel,
        grid=(num_tiles,),
        in_specs=in_specs,
        out_specs=out_specs,
        out_shape=out_shape,
        # Each tile writes its own output block -> batch axis is "parallel"
        # (lets v7x's second TensorCore participate; neutral on v5e/v6e).
        compiler_params=pltpu.CompilerParams(
            dimension_semantics=("parallel",),
            vmem_limit_bytes=32 * 1024 * 1024),
        cost_estimate=pl.CostEstimate(flops=int(flops),
                                      transcendentals=int(transcendentals),
                                      bytes_accessed=int(bytes_accessed)),
    )(x_p, labels_p, *padded_weights)

    inv_b = jnp.float32(1.0 / bsz)
    loss = jnp.sum(partials[:, 0, 0]) * inv_b            # tiny final mean in XLA
    acc = jnp.sum(partials[:, 0, 1]) * inv_b

    # TODO(synk): utils.get_accuracy is undefined upstream; standard top-1 accuracy used.
    return {"Loss": loss, "classification_accuracy": acc}


# ----------------------------- reference -------------------------------------

def _ref_forward(sample, labels, params, num_classes):
    hp = jax.lax.Precision.HIGHEST

    def ln(z):
        return z / (jnp.sqrt(jnp.mean(z * z, axis=1, keepdims=True)) + EPS)

    bsz = sample.shape[0]
    x = ln(sample.reshape(bsz, -1).astype(jnp.float32))
    for (w, b) in params["blocks"]:
        x = ln(jnp.maximum(jnp.dot(x, w, precision=hp) + b, 0.0))
    logits = jnp.dot(x, params["cls"], precision=hp)
    logits = logits - jnp.max(logits, axis=-1, keepdims=True)
    lse = jax.nn.logsumexp(logits, axis=-1)
    loss = jnp.mean(lse - logits[jnp.arange(bsz), labels])
    acc = jnp.mean((jnp.argmax(logits, axis=-1) == labels).astype(jnp.float32))
    return loss, acc


# ----------------------------- main -------------------------------------------

if __name__ == "__main__":
    # small config consistent with the fully-connected FF_model path
    batch = 20                  # not a tile multiple -> exercises row masking
    in_chw = (1, 8, 8)          # sample is an NCHW image, flattened in forward
    input_size = 1 * 8 * 8      # 64
    hidden_dims = [32, 32]      # num_blocks = 2 (block[0] linear of each block)
    num_classes = 10

    key = jax.random.PRNGKey(0)
    k_param, k_x, k_y, k_cls = jax.random.split(key, 4)

    params = init_params(k_param, input_size, hidden_dims, num_classes)
    real_dims, padded_weights = pad_params(params, num_classes)   # pad ONCE, reuse

    sample = jax.random.normal(k_x, (batch,) + in_chw, dtype=jnp.float32)
    class_labels = jax.random.randint(k_y, (batch,), 0, num_classes, dtype=jnp.int32)

    # tile_b=8 -> 3 grid steps: exercises the multi-tile partial-output path + masking.
    out = ff_model_forward(sample, class_labels, padded_weights,
                           real_dims=real_dims, num_classes=num_classes, tile_b=8)
    out = jax.tree_util.tree_map(jax.block_until_ready, out)
    ref_loss, ref_acc = _ref_forward(sample, class_labels, params, num_classes)
    assert jnp.allclose(out["Loss"], ref_loss, atol=1e-5, rtol=1e-4), (
        out["Loss"], ref_loss)
    assert jnp.allclose(out["classification_accuracy"], ref_acc, atol=1e-6), (
        out["classification_accuracy"], ref_acc)

    # Second check with a non-zero classifier weight so the softmax / argmax path
    # is actually exercised (the faithful zero-init classifier makes it trivial).
    # Default tile_b -> single grid step path.
    params_rnd = dict(params)
    params_rnd["cls"] = jax.random.normal(
        k_cls, (hidden_dims[-1], num_classes), dtype=jnp.float32)
    real_dims2, padded_weights2 = pad_params(params_rnd, num_classes)
    out2 = ff_model_forward(sample, class_labels, padded_weights2,
                            real_dims=real_dims2, num_classes=num_classes)
    out2 = jax.tree_util.tree_map(jax.block_until_ready, out2)
    ref_loss2, ref_acc2 = _ref_forward(sample, class_labels, params_rnd, num_classes)
    assert jnp.allclose(out2["Loss"], ref_loss2, atol=1e-3, rtol=1e-3), (
        out2["Loss"], ref_loss2)
    assert jnp.allclose(out2["classification_accuracy"], ref_acc2, atol=1e-6), (
        out2["classification_accuracy"], ref_acc2)

    print("KERNEL_OK")
</pallas_src>

<mosaic_0001>
module attributes {stable_mosaic.version = 11 : i64} {
  func.func @kernel(%arg0: i32, %arg1: memref<8x64xf32, #tpu.memory_space<vmem>>, %arg2: memref<8x1xi32, #tpu.memory_space<vmem>>, %arg3: memref<64x128xf32, #tpu.memory_space<vmem>>, %arg4: memref<1x128xf32, #tpu.memory_space<vmem>>, %arg5: memref<128x128xf32, #tpu.memory_space<vmem>>, %arg6: memref<1x128xf32, #tpu.memory_space<vmem>>, %arg7: memref<128x128xf32, #tpu.memory_space<vmem>>, %arg8: memref<1x8x128xf32, #tpu.memory_space<vmem>>) attributes {dimension_semantics = [#tpu.dimension_semantics<parallel>], iteration_bounds = array<i64: 3>, scalar_prefetch = 0 : i64, scratch_operands = 0 : i64, tpu.core_type = #tpu.core_type<tc>, window_params = [{transform_indices = @transform_0, window_bounds = array<i64: 8, 64>}, {transform_indices = @transform_1, window_bounds = array<i64: 8, 1>}, {pipeline_mode = #tpu.pipeline_mode<synchronous>, transform_indices = @transform_2, window_bounds = array<i64: 64, 128>}, {pipeline_mode = #tpu.pipeline_mode<synchronous>, transform_indices = @transform_3, window_bounds = array<i64: 1, 128>}, {pipeline_mode = #tpu.pipeline_mode<synchronous>, transform_indices = @transform_4, window_bounds = array<i64: 128, 128>}, {pipeline_mode = #tpu.pipeline_mode<synchronous>, transform_indices = @transform_5, window_bounds = array<i64: 1, 128>}, {pipeline_mode = #tpu.pipeline_mode<synchronous>, transform_indices = @transform_6, window_bounds = array<i64: 128, 128>}, {transform_indices = @transform_7, window_bounds = array<i64: 1, 8, 128>}]} {
    %c0 = arith.constant 0 : index
    %c0_0 = arith.constant 0 : index
    %0 = vector.load %arg1[%c0, %c0_0] : memref<8x64xf32, #tpu.memory_space<vmem>>, vector<8x64xf32>
    %1 = arith.mulf %0, %0 : vector<8x64xf32>
    %cst = arith.constant dense<0.000000e+00> : vector<8xf32>
    %2 = vector.multi_reduction <add>, %1, %cst [1] : vector<8x64xf32> to vector<8xf32>
    %3 = vector.shape_cast %2 : vector<8xf32> to vector<8x1xf32>
    %cst_1 = arith.constant 1.562500e-02 : f32
    %4 = vector.broadcast %cst_1 : f32 to vector<8x1xf32>
    %5 = arith.mulf %3, %4 : vector<8x1xf32>
    %6 = math.sqrt %5 : vector<8x1xf32>
    %cst_2 = arith.constant 9.99999993E-9 : f32
    %7 = vector.broadcast %cst_2 : f32 to vector<8x1xf32>
    %8 = arith.addf %6, %7 : vector<8x1xf32>
    %9 = tpu.reciprocal %8 : vector<8x1xf32> -> vector<8x1xf32>
    %10 = vector.broadcast %9 : vector<8x1xf32> to vector<8x64xf32>
    %11 = arith.mulf %0, %10 : vector<8x64xf32>
    %c0_3 = arith.constant 0 : index
    %c0_4 = arith.constant 0 : index
    %12 = vector.load %arg3[%c0_3, %c0_4] : memref<64x128xf32, #tpu.memory_space<vmem>>, vector<64x128xf32>
    %c0_5 = arith.constant 0 : index
    %c0_6 = arith.constant 0 : index
    %13 = vector.load %arg4[%c0_5, %c0_6] : memref<1x128xf32, #tpu.memory_space<vmem>>, vector<1x128xf32>
    %cst_7 = arith.constant dense<0.000000e+00> : vector<8x128xf32>
    %14 = tpu.matmul %11, %12, %cst_7 {dimension_numbers = #tpu.dot_dimension_numbers<[1], [0], [0], [1], [0, 0, 1, 1], [], []>} : vector<8x64xf32>, vector<64x128xf32>, vector<8x128xf32> -> vector<8x128xf32>
    %15 = vector.broadcast %13 : vector<1x128xf32> to vector<8x128xf32>
    %16 = arith.addf %14, %15 : vector<8x128xf32>
    %cst_8 = arith.constant 0.000000e+00 : f32
    %17 = vector.broadcast %cst_8 : f32 to vector<8x128xf32>
    %18 = arith.maximumf %16, %17 : vector<8x128xf32>
    %19 = arith.mulf %18, %18 : vector<8x128xf32>
    %cst_9 = arith.constant dense<0.000000e+00> : vector<8xf32>
    %20 = vector.multi_reduction <add>, %19, %cst_9 [1] : vector<8x128xf32> to vector<8xf32>
    %21 = vector.shape_cast %20 : vector<8xf32> to vector<8x1xf32>
    %cst_10 = arith.constant 3.125000e-02 : f32
    %22 = vector.broadcast %cst_10 : f32 to vector<8x1xf32>
    %23 = arith.mulf %21, %22 : vector<8x1xf32>
    %24 = math.sqrt %23 : vector<8x1xf32>
    %cst_11 = arith.constant 9.99999993E-9 : f32
    %25 = vector.broadcast %cst_11 : f32 to vector<8x1xf32>
    %26 = arith.addf %24, %25 : vector<8x1xf32>
    %27 = tpu.reciprocal %26 : vector<8x1xf32> -> vector<8x1xf32>
    %28 = vector.broadcast %27 : vector<8x1xf32> to vector<8x128xf32>
    %29 = arith.mulf %18, %28 : vector<8x128xf32>
    %c0_12 = arith.constant 0 : index
    %c0_13 = arith.constant 0 : index
    %30 = vector.load %arg5[%c0_12, %c0_13] : memref<128x128xf32, #tpu.memory_space<vmem>>, vector<128x128xf32>
    %c0_14 = arith.constant 0 : index
    %c0_15 = arith.constant 0 : index
    %31 = vector.load %arg6[%c0_14, %c0_15] : memref<1x128xf32, #tpu.memory_space<vmem>>, vector<1x128xf32>
    %cst_16 = arith.constant dense<0.000000e+00> : vector<8x128xf32>
    %32 = tpu.matmul %29, %30, %cst_16 {dimension_numbers = #tpu.dot_dimension_numbers<[1], [0], [0], [1], [0, 0, 1, 1], [], []>} : vector<8x128xf32>, vector<128x128xf32>, vector<8x128xf32> -> vector<8x128xf32>
    %33 = vector.broadcast %31 : vector<1x128xf32> to vector<8x128xf32>
    %34 = arith.addf %32, %33 : vector<8x128xf32>
    %cst_17 = arith.constant 0.000000e+00 : f32
    %35 = vector.broadcast %cst_17 : f32 to vector<8x128xf32>
    %36 = arith.maximumf %34, %35 : vector<8x128xf32>
    %37 = arith.mulf %36, %36 : vector<8x128xf32>
    %cst_18 = arith.constant dense<0.000000e+00> : vector<8xf32>
    %38 = vector.multi_reduction <add>, %37, %cst_18 [1] : vector<8x128xf32> to vector<8xf32>
    %39 = vector.shape_cast %38 : vector<8xf32> to vector<8x1xf32>
    %cst_19 = arith.constant 3.125000e-02 : f32
    %40 = vector.broadcast %cst_19 : f32 to vector<8x1xf32>
    %41 = arith.mulf %39, %40 : vector<8x1xf32>
    %42 = math.sqrt %41 : vector<8x1xf32>
    %cst_20 = arith.constant 9.99999993E-9 : f32
    %43 = vector.broadcast %cst_20 : f32 to vector<8x1xf32>
    %44 = arith.addf %42, %43 : vector<8x1xf32>
    %45 = tpu.reciprocal %44 : vector<8x1xf32> -> vector<8x1xf32>
    %46 = vector.broadcast %45 : vector<8x1xf32> to vector<8x128xf32>
    %47 = arith.mulf %36, %46 : vector<8x128xf32>
    %c0_21 = arith.constant 0 : index
    %c0_22 = arith.constant 0 : index
    %48 = vector.load %arg7[%c0_21, %c0_22] : memref<128x128xf32, #tpu.memory_space<vmem>>, vector<128x128xf32>
    %cst_23 = arith.constant dense<0.000000e+00> : vector<8x128xf32>
    %49 = tpu.matmul %47, %48, %cst_23 {dimension_numbers = #tpu.dot_dimension_numbers<[1], [0], [0], [1], [0, 0, 1, 1], [], []>} : vector<8x128xf32>, vector<128x128xf32>, vector<8x128xf32> -> vector<8x128xf32>
    %50 = tpu.iota {dimensions = array<i32: 1>} : vector<8x128xi32>
    %c10_i32 = arith.constant 10 : i32
    %51 = vector.broadcast %c10_i32 : i32 to vector<8x128xi32>
    %52 = arith.cmpi slt, %50, %51 : vector<8x128xi32>
    %cst_24 = arith.constant -1.000000e+30 : f32
    %53 = vector.broadcast %cst_24 : f32 to vector<8x128xf32>
    %54 = arith.select %52, %49, %53 : vector<8x128xi1>, vector<8x128xf32>
    %cst_25 = arith.constant dense<0xFF800000> : vector<8xf32>
    %55 = vector.multi_reduction <maximumf>, %54, %cst_25 [1] : vector<8x128xf32> to vector<8xf32>
    %56 = vector.shape_cast %55 : vector<8xf32> to vector<8x1xf32>
    %57 = vector.broadcast %56 : vector<8x1xf32> to vector<8x128xf32>
    %58 = arith.subf %54, %57 : vector<8x128xf32>
    %59 = math.exp %58 : vector<8x128xf32>
    %cst_26 = arith.constant dense<0.000000e+00> : vector<8xf32>
    %60 = vector.multi_reduction <add>, %59, %cst_26 [1] : vector<8x128xf32> to vector<8xf32>
    %61 = vector.shape_cast %60 : vector<8xf32> to vector<8x1xf32>
    %62 = math.log %61 : vector<8x1xf32>
    %c0_27 = arith.constant 0 : index
    %c0_28 = arith.constant 0 : index
    %63 = vector.load %arg2[%c0_27, %c0_28] : memref<8x1xi32, #tpu.memory_space<vmem>>, vector<8x1xi32>
    %64 = vector.broadcast %63 : vector<8x1xi32> to vector<8x128xi32>
    %65 = arith.cmpi eq, %50, %64 : vector<8x128xi32>
    %cst_29 = arith.constant 0.000000e+00 : f32
    %66 = vector.broadcast %cst_29 : f32 to vector<8x128xf32>
    %67 = arith.select %65, %58, %66 : vector<8x128xi1>, vector<8x128xf32>
    %cst_30 = arith.constant dense<0.000000e+00> : vector<8xf32>
    %68 = vector.multi_reduction <add>, %67, %cst_30 [1] : vector<8x128xf32> to vector<8xf32>
    %69 = vector.shape_cast %68 : vector<8xf32> to vector<8x1xf32>
    %70 = arith.subf %62, %69 : vector<8x1xf32>
    %cst_31 = arith.constant 0.000000e+00 : f32
    %71 = vector.broadcast %cst_31 : f32 to vector<8x128xf32>
    %72 = arith.cmpf oge, %58, %71 : vector<8x128xf32>
    %c128_i32 = arith.constant 128 : i32
    %73 = vector.broadcast %c128_i32 : i32 to vector<8x128xi32>
    %74 = arith.select %72, %50, %73 : vector<8x128xi1>, vector<8x128xi32>
    %cst_32 = arith.constant dense<2147483647> : vector<8xi32>
    %75 = vector.multi_reduction <minsi>, %74, %cst_32 [1] : vector<8x128xi32> to vector<8xi32>
    %76 = vector.shape_cast %75 : vector<8xi32> to vector<8x1xi32>
    %77 = arith.cmpi eq, %76, %63 : vector<8x1xi32>
    %78 = arith.extui %77 : vector<8x1xi1> to vector<8x1xi32>
    %79 = arith.sitofp %78 : vector<8x1xi32> to vector<8x1xf32>
    %80 = tpu.iota {dimensions = array<i32: 0>} : vector<8x1xi32>
    %c8_i32 = arith.constant 8 : i32
    %81 = arith.muli %arg0, %c8_i32 : i32
    %82 = vector.broadcast %81 : i32 to vector<8x1xi32>
    %83 = arith.addi %80, %82 : vector<8x1xi32>
    %c20_i32 = arith.constant 20 : i32
    %84 = vector.broadcast %c20_i32 : i32 to vector<8x1xi32>
    %85 = arith.cmpi slt, %83, %84 : vector<8x1xi32>
    %86 = arith.extui %85 : vector<8x1xi1> to vector<8x1xi32>
    %87 = arith.sitofp %86 : vector<8x1xi32> to vector<8x1xf32>
    %88 = arith.mulf %70, %87 : vector<8x1xf32>
    %89 = vector.shape_cast %88 : vector<8x1xf32> to vector<1x8x1xf32>
    %cst_33 = arith.constant dense<0.000000e+00> : vector<1xf32>
    %90 = vector.multi_reduction <add>, %89, %cst_33 [1, 2] : vector<1x8x1xf32> to vector<1xf32>
    %91 = vector.shape_cast %90 : vector<1xf32> to vector<1x1x1xf32>
    %92 = vector.extract %91[0, 0, 0] : f32 from vector<1x1x1xf32>
    %93 = arith.mulf %79, %87 : vector<8x1xf32>
    %94 = vector.shape_cast %93 : vector<8x1xf32> to vector<1x8x1xf32>
    %cst_34 = arith.constant dense<0.000000e+00> : vector<1xf32>
    %95 = vector.multi_reduction <add>, %94, %cst_34 [1, 2] : vector<1x8x1xf32> to vector<1xf32>
    %96 = vector.shape_cast %95 : vector<1xf32> to vector<1x1x1xf32>
    %97 = vector.extract %96[0, 0, 0] : f32 from vector<1x1x1xf32>
    %98 = tpu.iota {dimensions = array<i32: 2>} : vector<1x8x128xi32>
    %c0_i32 = arith.constant 0 : i32
    %99 = vector.broadcast %c0_i32 : i32 to vector<1x8x128xi32>
    %100 = arith.cmpi eq, %98, %99 : vector<1x8x128xi32>
    %c1_i32 = arith.constant 1 : i32
    %101 = vector.broadcast %c1_i32 : i32 to vector<1x8x128xi32>
    %102 = arith.cmpi eq, %98, %101 : vector<1x8x128xi32>
    %cst_35 = arith.constant 0.000000e+00 : f32
    %103 = vector.broadcast %97 : f32 to vector<1x8x128xf32>
    %104 = vector.broadcast %cst_35 : f32 to vector<1x8x128xf32>
    %105 = arith.select %102, %103, %104 : vector<1x8x128xi1>, vector<1x8x128xf32>
    %106 = vector.broadcast %92 : f32 to vector<1x8x128xf32>
    %107 = arith.select %100, %106, %105 : vector<1x8x128xi1>, vector<1x8x128xf32>
    %c0_36 = arith.constant 0 : index
    %c0_37 = arith.constant 0 : index
    %c0_38 = arith.constant 0 : index
    %108 = vector.load %arg8[%c0_36, %c0_37, %c0_38] : memref<1x8x128xf32, #tpu.memory_space<vmem>>, vector<1x8x128xf32>
    tpu.vector_store %arg8[%c0_36, %c0_37, %c0_38], %107 {strides = array<i32>} : memref<1x8x128xf32, #tpu.memory_space<vmem>>, vector<1x8x128xf32>,
    return
  }
  func.func @transform_0(%arg0: i32) -> (i32, i32) {
    %c0_i32 = arith.constant 0 : i32
    %c0_i32_0 = arith.constant 0 : i32
    return %arg0, %c0_i32 : i32, i32
  }
  func.func @transform_1(%arg0: i32) -> (i32, i32) {
    %c0_i32 = arith.constant 0 : i32
    %c0_i32_0 = arith.constant 0 : i32
    return %arg0, %c0_i32 : i32, i32
  }
  func.func @transform_2(%arg0: i32) -> (i32, i32) {
    %c0_i32 = arith.constant 0 : i32
    %c0_i32_0 = arith.constant 0 : i32
    %c0_i32_1 = arith.constant 0 : i32
    return %c0_i32, %c0_i32_0 : i32, i32
  }
  func.func @transform_3(%arg0: i32) -> (i32, i32) {
    %c0_i32 = arith.constant 0 : i32
    %c0_i32_0 = arith.constant 0 : i32
    %c0_i32_1 = arith.constant 0 : i32
    return %c0_i32, %c0_i32_0 : i32, i32
  }
  func.func @transform_4(%arg0: i32) -> (i32, i32) {
    %c0_i32 = arith.constant 0 : i32
    %c0_i32_0 = arith.constant 0 : i32
    %c0_i32_1 = arith.constant 0 : i32
    return %c0_i32, %c0_i32_0 : i32, i32
  }
  func.func @transform_5(%arg0: i32) -> (i32, i32) {
    %c0_i32 = arith.constant 0 : i32
    %c0_i32_0 = arith.constant 0 : i32
    %c0_i32_1 = arith.constant 0 : i32
    return %c0_i32, %c0_i32_0 : i32, i32
  }
  func.func @transform_6(%arg0: i32) -> (i32, i32) {
    %c0_i32 = arith.constant 0 : i32
    %c0_i32_0 = arith.constant 0 : i32
    %c0_i32_1 = arith.constant 0 : i32
    return %c0_i32, %c0_i32_0 : i32, i32
  }
  func.func @transform_7(%arg0: i32) -> (i32, i32, i32) {
    %c0_i32 = arith.constant 0 : i32
    %c0_i32_0 = arith.constant 0 : i32
    %c0_i32_1 = arith.constant 0 : i32
    return %arg0, %c0_i32, %c0_i32_0 : i32, i32, i32
  }
}

</mosaic_0001>

<bundles_post_ra>
// kernel: ff_model_forward.1
= control target key start
LH: loop header
LB: loop body
LE: loop exit
PB: predicated region body
PF: predicated region fallthrough
CT: control target
= control target key end

     0   :  { %12 = vsyncpa [#allocation3], 0  ;;  %s1316_s0 = inlined_call_operand.vmem [shape: f32[24,64], index: 0, kind: input, shape index: {}]   ;;  %s1317_s1 = inlined_call_operand.vmem [shape: s32[24,1], index: 1, kind: input, shape index: {}]   ;;  %s1318_s2 = inlined_call_operand.hbm [shape: f32[64,128], index: 2, kind: input, shape index: {}]   ;;  %s1319_s3 = inlined_call_operand.vmem [shape: f32[1,128], index: 3, kind: input, shape index: {}]   ;;  %s1320_s4 = inlined_call_operand.vmem [shape: f32[128,128], index: 4, kind: input, shape index: {}]   ;;  %s1321_s5 = inlined_call_operand.vmem [shape: f32[1,128], index: 5, kind: input, shape index: {}]   ;;  %s1322_s6 = inlined_call_operand.hbm [shape: f32[128,128], index: 6, kind: input, shape index: {}]   ;;  %s1323_s7 = inlined_call_operand.vmem [shape: f32[3,8,128], index: 7, kind: output, shape index: {}]  }
   0x1   :  { %13 = vsyncpa [#allocation5], 0  ;;  %s1124_s24 = smov 0  }
   0x2 LB: > { %s1130_s25 = sadd.s32 4294967295, %s1075_s24   ;;  %p803_p0 = scmp.ge.s32.totalorder %s1075_s24, 1  ;;  %s1075_s24 = sphi %s1124_s24, %s19_s24  }
   0x3   : > { %p207_p1 = scmp.lt.s32.totalorder %s1075_s24, 4  ;;  %s1077_s26 = smov [#allocation2]  }
   0x4   : > { %s219_s27 = sshll.u32 %s1077_s26, 4  ;;  %p972_p3 = scmp.eq.s32.totalorder %s1130_s25, 0  ;;  %s220_s27 = int_to_ptr.vmem [resolvable:$true] %s219_s27 }
   0x5   : > { %p1134_p2 = pnand %p803_p0, %p207_p1  ;;  %s1078_s29 = smov [#allocation4]  }
   0x6   : > { %s241_s30 = sshll.u32 %s1078_s29, 4  ;;  %s1020_s9 = scalar_lea.vmem %s220_s27, 1024  ;;  %s242_s30 = int_to_ptr.vmem [resolvable:$true] %s241_s30 }
   0x7   : > { %p965_p4 = pneg %p1134_p2  ;;  %p1021_p7 = scmp.ne.s32.totalorder %s220_s27, %s1020_s9 }
   0x8   : > { %p1028_p10 = scmp.lt.s32.totalorder %s220_s27, %s220_s27  ;;  %p1029_p11 = scmp.lt.s32.totalorder %s1020_s9, %s1020_s9 }
   0x9   : > { %p1143_p5 = pnand %p972_p3, %p965_p4 }
   0xa   : > { %p1030_p12 = por %p1029_p11, %p1028_p10 }
   0xb   : > { %p1011_p6 = pneg %p1143_p5 }
   0xd   : > { %p1023_p8 = pnand %p1021_p7, %p1011_p6 }
   0xf   : > { %p1024_p9 = pneg %p1023_p8 }
  0x11   : > { %p1031_p13 = pnand %p1030_p12, %p1024_p9 }
  0x13   : > { %1034 = shalt.err (!%p1031_p13)
}
  0x14   : > { %s1079_s10 = smov 128   ;;  %s1080_s11 = smov 8  }
  0x15   : > { %968 = dma.hbm_to_vmem [thread:$0]  (!%p1143_p5), %s1318_s2, 1024, %s220_s27, [#allocation3], %s1079_s10, %s1079_s10, %s1080_s11  }
  0x16   : > { %s1046_s14 = scalar_lea.vmem %s242_s30, 2048  ;;  %p1054_p7 = scmp.lt.s32.totalorder %s242_s30, %s242_s30 }
  0x17   : > { %p1047_p0 = scmp.ne.s32.totalorder %s242_s30, %s1046_s14  ;;  %p1055_p8 = scmp.lt.s32.totalorder %s1046_s14, %s1046_s14 }
  0x19   : > { %p1049_p1 = pnand %p1047_p0, %p1011_p6  ;;  %p1056_p10 = por %p1055_p8, %p1054_p7 }
  0x1b   : > { %p1050_p4 = pneg %p1049_p1 }
  0x1d   : > { %p1057_p9 = pnand %p1056_p10, %p1050_p4 }
  0x1f   : > { %1060 = shalt.err (!%p1057_p9)
}
  0x20   : > { %971 = dma.hbm_to_vmem [thread:$0]  (!%p1143_p5), %s1322_s6, 2048, %s242_s30, [#allocation5], %s1079_s10, %s1079_s10, %s1080_s11  }
  0x21   : > { %271 = sbr.rel (%p1134_p2) target bundleno = 1809 (0x711), region = 48 }
  0x26   : > { %1066 = dma.done.wait (%p972_p3), [#allocation3], 1024  }
  0x27   : > { %1068 = vsyncadd (%p972_p3), [#allocation3], 4294966272 }
  0x28   : > { %1070 = dma.done.wait (%p972_p3), [#allocation5], 2048  }
  0x29   : > { %1072 = vsyncadd (%p972_p3), [#allocation5], 4294965248  ;;  %p309_p6 = scmp.lt.s32.totalorder %s1130_s25, 2  ;;  %vm323_vm0 = vcmask 523264   ;;  %v345_v3 = vld [vmem:[#allocation2 + $0x38] sm:$0xff]  ;;  %v1081_v4 = vmov 0.0  }
  0x2a   : > { %864 = vmatprep.subr.mxu0 %v1081_v4  ;;  %v344_v5 = vld [vmem:[#allocation2 + $0x30] sm:$0xff]  ;;  %vm1082_vm1 = vmmov 0   ;;  %883 = vmatprep.subr.mxu1 %v1081_v4  ;;  %v343_v6 = vld [vmem:[#allocation2 + $0x28] sm:$0xff]  ;;  %v342_v7 = vld [vmem:[#allocation2 + $0x20] sm:$0xff]  ;;  %vm685_vm14 = vcmask 7168  }
  0x2b   : > { %s310_s17 = scalar_select %p309_p6, %s1130_s25, 2  ;;  %880 = vmatprep.mubr.msk.f32.mxu0 %vm1082_vm1, %v1081_v4  ;;  %865 = vmatpush3.msra.mxu0 %v345_v3  ;;  %v341_v8 = vld [vmem:[#allocation2 + $0x18] sm:$0xff]  ;;  %v340_v9 = vld [vmem:[#allocation2 + $0x10] sm:$0xff]  ;;  %v339_v10 = vld [vmem:[#allocation2 + $0x8] sm:$0xff] }
  0x2c   : > { %866 = vmatprep.subr.mxu0 %v1081_v4  ;;  %915 = vmatprep.mubr.msk.f32.mxu1 %vm1082_vm1, %v1081_v4  ;;  %v338_v11 = vld [vmem:[#allocation2] sm:$0xff]  ;;  %v456_v28 = vld [vmem:[%s1320_s4 + $0x78] sm:$0xff]  ;;  %v455_v29 = vld [vmem:[%s1320_s4 + $0x70] sm:$0xff] }
  0x2d   : > { %s1177_s18 = sshll.u32 %s310_s17, 3  ;;  %867 = vmatpush3.msra.mxu0 %v344_v5  ;;  %v813_v22 = vld [vmem:[%s1319_s3] ss:$0 sm:$0xff]  ;;  %884 = vmatpush3.msra.mxu1 %v456_v28  ;;  %v454_v30 = vld [vmem:[%s1320_s4 + $0x68] sm:$0xff]  ;;  %v452_v32 = vld [vmem:[%s1320_s4 + $0x58] sm:$0xff] }
  0x2e   : > { %s312_s21 = scalar_lea.vmem %s1316_s0, %s1177_s18  ;;  %868 = vmatprep.subr.mxu0 %v1081_v4  ;;  %885 = vmatprep.subr.mxu1 %v1081_v4  ;;  %v453_v31 = vld [vmem:[%s1320_s4 + $0x60] sm:$0xff]  ;;  %v451_v33 = vld [vmem:[%s1320_s4 + $0x50] sm:$0xff]  ;;  %v450_v34 = vld [vmem:[%s1320_s4 + $0x48] sm:$0xff]  ;;  %s316_s20 = scalar_lea.vmem %s1317_s1, %s1177_s18 }
  0x2f   : > { %v321_v0 = vld [vmem:[%s312_s21] sm:$0xff]  ;;  %869 = vmatpush3.msra.mxu0 %v343_v6  ;;  %886 = vmatpush3.msra.mxu1 %v455_v29  ;;  %v448_v36 = vld [vmem:[%s1320_s4 + $0x38] sm:$0xff]  ;;  %v447_v37 = vld [vmem:[%s1320_s4 + $0x30] sm:$0xff]  ;;  %s817_s21 = sshll.u32 %s1130_s25, 3  ;;  %s320_s27 = scalar_lea.vmem %s1323_s7, %s1177_s18 }
  0x30   : > { %v322_v1 = vmul.f32 %v321_v0, %v321_v0  ;;  %870 = vmatprep.subr.mxu0 %v1081_v4  ;;  %887 = vmatprep.subr.mxu1 %v1081_v4  ;;  %v449_v35 = vld [vmem:[%s1320_s4 + $0x40] sm:$0xff]  ;;  %v446_v38 = vld [vmem:[%s1320_s4 + $0x28] sm:$0xff]  ;;  %v444_v40 = vld [vmem:[%s1320_s4 + $0x18] sm:$0xff] }
  0x31   : > { %871 = vmatpush3.msra.mxu0 %v342_v7  ;;  %888 = vmatpush3.msra.mxu1 %v454_v30  ;;  %v445_v39 = vld [vmem:[%s1320_s4 + $0x20] sm:$0xff]  ;;  %v443_v41 = vld [vmem:[%s1320_s4 + $0x10] sm:$0xff]  ;;  %v442_v42 = vld [vmem:[%s1320_s4 + $0x8] sm:$0xff] }
  0x32   : > { %v324_v2 = vsel %vm323_vm0, %v322_v1, 0.0  ;;  %872 = vmatprep.subr.mxu0 %v1081_v4  ;;  %889 = vmatprep.subr.mxu1 %v1081_v4  ;;  %v441_v43 = vld [vmem:[%s1320_s4] sm:$0xff]  ;;  %v564_v60 = vld [vmem:[#allocation4 + $0x78] sm:$0xff]  ;;  %v563_v61 = vld [vmem:[#allocation4 + $0x70] sm:$0xff] }
  0x33   : > { %325 = vadd.xlane.f32.xlu0 %v324_v2  ;;  %873 = vmatpush3.msra.mxu0 %v341_v8  ;;  %v815_v54 = vld [vmem:[%s1321_s5] ss:$0 sm:$0xff]  ;;  %v562_v62 = vld [vmem:[#allocation4 + $0x68] sm:$0xff]  ;;  %v559_v1 = vld [vmem:[#allocation4 + $0x50] sm:$0xff] }
  0x34   : > { %874 = vmatprep.subr.mxu0 %v1081_v4  ;;  %890 = vmatpush3.msra.mxu1 %v453_v31  ;;  %v561_v63 = vld [vmem:[#allocation4 + $0x60] sm:$0xff]  ;;  %v558_v2 = vld [vmem:[#allocation4 + $0x48] sm:$0xff]  ;;  %v556_v5 = vld [vmem:[#allocation4 + $0x38] sm:$0xff] }
  0x35   : > { %875 = vmatpush3.msra.mxu0 %v340_v9  ;;  %891 = vmatprep.subr.mxu1 %v1081_v4  ;;  %v557_v3 = vld [vmem:[#allocation4 + $0x40] sm:$0xff]  ;;  %v555_v6 = vld [vmem:[#allocation4 + $0x30] sm:$0xff]  ;;  %v554_v7 = vld [vmem:[#allocation4 + $0x28] sm:$0xff] }
  0x36   : > { %876 = vmatprep.subr.mxu0 %v1081_v4  ;;  %892 = vmatpush3.msra.mxu1 %v452_v32  ;;  %v553_v8 = vld [vmem:[#allocation4 + $0x20] sm:$0xff]  ;;  %v552_v9 = vld [vmem:[#allocation4 + $0x18] sm:$0xff] }
  0x37   : > { %877 = vmatpush3.msra.mxu0 %v339_v10  ;;  %893 = vmatprep.subr.mxu1 %v1081_v4  ;;  %v551_v10 = vld [vmem:[#allocation4 + $0x10] sm:$0xff]  ;;  %v648_v29 = vld [vmem:[%s316_s20] sm:$0xff] }
  0x38   : > { %878 = vmatprep.subr.mxu0 %v1081_v4  ;;  %894 = vmatpush3.msra.mxu1 %v451_v33 }
  0x39   : > { %879 = vmatpush3.msra.mxu0 %v338_v11  ;;  %895 = vmatprep.subr.mxu1 %v1081_v4  ;;  %v550_v11 = vld [vmem:[#allocation4 + $0x8] sm:$0xff] }
  0x3a   : > { %918 = vmatprep.subr.mxu0 %v1081_v4  ;;  %896 = vmatpush3.msra.mxu1 %v450_v34 }
  0x3b   : > { %897 = vmatprep.subr.mxu1 %v1081_v4 }
  0x3c   : > { %898 = vmatpush3.msra.mxu1 %v449_v35 }
  0x3d   : > { %899 = vmatprep.subr.mxu1 %v1081_v4 }
  0x3e   : > { %900 = vmatpush3.msra.mxu1 %v448_v36 }
  0x3f   : > { %901 = vmatprep.subr.mxu1 %v1081_v4 }
  0x40   : > { %902 = vmatpush3.msra.mxu1 %v447_v37 }
  0x41   : > { %903 = vmatprep.subr.mxu1 %v1081_v4 }
  0x42   : > { %904 = vmatpush3.msra.mxu1 %v446_v38 }
  0x43   : > { %905 = vmatprep.subr.mxu1 %v1081_v4 }
  0x44   : > { %906 = vmatpush3.msra.mxu1 %v445_v39 }
  0x45   : > { %907 = vmatprep.subr.mxu1 %v1081_v4 }
  0x46   : > { %908 = vmatpush3.msra.mxu1 %v444_v40 }
  0x47   : > { %909 = vmatprep.subr.mxu1 %v1081_v4 }
  0x48   : > { %910 = vmatpush3.msra.mxu1 %v443_v41 }
  0x49   : > { %911 = vmatprep.subr.mxu1 %v1081_v4 }
  0x4a   : > { %912 = vmatpush3.msra.mxu1 %v442_v42 }
  0x4b   : > { %913 = vmatprep.subr.mxu1 %v1081_v4 }
  0x4c   : > { %914 = vmatpush3.msra.mxu1 %v441_v43 }
  0xbc   : > { %v326_v12 = vpop.xlane.xlu0 %325 }
  0xbd   : > { %v327_v13 = vmul.f32 0.015625, %v326_v12  ;;  %v549_v12 = vld [vmem:[#allocation4] sm:$0xff] }
  0xbf   : > { %993 = vrsqrt.f32 %v327_v13  ;;  %vm330_vm2 = vcmp.eq.f32.partialorder %v327_v13, inf  ;;  %v333_v16 = vand.u32 2147483648, %v327_v13  ;;  %vm332_vm3 = vcmp.eq.f32.partialorder %v327_v13, 0.0 }
  0xcc   : > { %v994_v14 = vpop.eup %993 }
  0xcd   : > { %v329_v15 = vmul.f32 %v994_v14, %v327_v13 }
  0xcf   : > { %v331_v17 = vsel %vm330_vm2, %v327_v13, %v329_v15 }
  0xd0   : > { %v334_v18 = vsel %vm332_vm3, %v333_v16, %v331_v17 }
  0xd1   : > { %v335_v19 = vadd.f32 1e-08, %v334_v18 }
  0xd3   : > { %995 = vrcp.f32 %v335_v19 }
  0xe0   : > { %v996_v20 = vpop.eup %995 }
  0xe1   : > { %v337_v21 = vmul.f32 %v996_v20, %v321_v0  ;;  %v560_v0 = vld [vmem:[#allocation4 + $0x58] sm:$0xff] }
  0xe3   : > { %881 = vmatmul.mubr.msk.f32.vlgmr.msra.gmra.mxu0 %vm323_vm0, %v337_v21 }
  0xe4   : > { %950 = vmatprep.mubr.msk.f32.mxu0 %vm1082_vm1, %v1081_v4  ;;  %919 = vmatpush3.msra.mxu0 %v564_v60 }
  0xe5   : > { %920 = vmatprep.subr.mxu0 %v1081_v4 }
  0xe6   : > { %921 = vmatpush3.msra.mxu0 %v563_v61 }
  0xe7   : > { %922 = vmatprep.subr.mxu0 %v1081_v4 }
  0xe8   : > { %923 = vmatpush3.msra.mxu0 %v562_v62 }
  0xe9   : > { %924 = vmatprep.subr.mxu0 %v1081_v4 }
  0xea   : > { %925 = vmatpush3.msra.mxu0 %v561_v63 }
  0xeb   : > { %926 = vmatprep.subr.mxu0 %v1081_v4 }
  0xec   : > { %927 = vmatpush3.msra.mxu0 %v560_v0 }
  0xed   : > { %928 = vmatprep.subr.mxu0 %v1081_v4 }
  0xee   : > { %929 = vmatpush3.msra.mxu0 %v559_v1 }
  0xef   : > { %930 = vmatprep.subr.mxu0 %v1081_v4 }
  0xf0   : > { %931 = vmatpush3.msra.mxu0 %v558_v2 }
  0xf1   : > { %932 = vmatprep.subr.mxu0 %v1081_v4 }
  0xf2   : > { %933 = vmatpush3.msra.mxu0 %v557_v3 }
  0xf3   : > { %934 = vmatprep.subr.mxu0 %v1081_v4 }
  0xf4   : > { %935 = vmatpush3.msra.mxu0 %v556_v5 }
  0xf5   : > { %936 = vmatprep.subr.mxu0 %v1081_v4 }
  0xf6   : > { %937 = vmatpush3.msra.mxu0 %v555_v6 }
  0xf7   : > { %938 = vmatprep.subr.mxu0 %v1081_v4 }
  0xf8   : > { %939 = vmatpush3.msra.mxu0 %v554_v7 }
  0xf9   : > { %940 = vmatprep.subr.mxu0 %v1081_v4 }
  0xfa   : > { %941 = vmatpush3.msra.mxu0 %v553_v8 }
  0xfb   : > { %942 = vmatprep.subr.mxu0 %v1081_v4 }
  0xfc   : > { %943 = vmatpush3.msra.mxu0 %v552_v9 }
  0xfd   : > { %944 = vmatprep.subr.mxu0 %v1081_v4 }
  0xfe   : > { %945 = vmatpush3.msra.mxu0 %v551_v10 }
  0xff   : > { %946 = vmatprep.subr.mxu0 %v1081_v4 }
 0x100   : > { %947 = vmatpush3.msra.mxu0 %v550_v11 }
 0x101   : > { %948 = vmatprep.subr.mxu0 %v1081_v4 }
 0x102   : > { %949 = vmatpush3.msra.mxu0 %v549_v12 }
 0x1a3   : > { %v422_v23 = vpop.f32.mrf.mxu0 }
 0x1a4   : > { %v423_v24 = vadd.f32 %v813_v22, %v422_v23  ;;  %v1083_v23 = vmov 0  }
 0x1a5   : > { %v882_v25 = vpop.f32.mrf.mxu0  ;;  %991 = vset.pattern.permute.xlu1 %v1083_v23  ;;  %992 = vset.pattern.permute.xlu0 %v1083_v23 }
 0x1a6   : > { %v1204_v26 = vmax.f32 %v423_v24, 0.0  ;;  %v635_v24 = vlaneseq }
 0x1a8   : > { %v427_v27 = vmul.f32 %v1204_v26, %v1204_v26  ;;  %v1295_v25 = vand.u32 127, %v635_v24 }
 0x1aa   : > { %428 = vadd.xlane.f32.xlu0 %v427_v27  ;;  %vm637_vm8 = vcmp.lt.s32.totalorder %v1295_v25, 10  ;;  %vm708_vm15 = vcmp.eq.s32.totalorder %v1295_v25, 1  ;;  %vm707_vm0 = vcmp.eq.s32.totalorder %v1295_v25, 0 }
 0x233   : > { %v429_v44 = vpop.xlane.xlu0 %428 }
 0x234   : > { %v430_v45 = vmul.f32 0.03125, %v429_v44  ;;  %v677_v44 = vshrl.u32 %v635_v24, 7 }
 0x236   : > { %997 = vrsqrt.f32 %v430_v45  ;;  %vm433_vm4 = vcmp.eq.f32.partialorder %v430_v45, inf  ;;  %v436_v48 = vand.u32 2147483648, %v430_v45  ;;  %vm435_vm5 = vcmp.eq.f32.partialorder %v430_v45, 0.0 }
 0x243   : > { %v998_v46 = vpop.eup %997 }
 0x244   : > { %v432_v47 = vmul.f32 %v998_v46, %v430_v45 }
 0x246   : > { %v434_v49 = vsel %vm433_vm4, %v430_v45, %v432_v47  ;;  %v679_v45 = vstv %s817_s21 }
 0x247   : > { %v437_v50 = vsel %vm435_vm5, %v436_v48, %v434_v49  ;;  %v680_v47 = vadd.s32 %v679_v45, %v677_v44 }
 0x248   : > { %v438_v51 = vadd.f32 1e-08, %v437_v50 }
 0x249   : > { %vm681_vm12 = vcmp.lt.s32.totalorder %v680_v47, 20 }
 0x24a   : > { %999 = vrcp.f32 %v438_v51 }
 0x257   : > { %v1000_v52 = vpop.eup %999 }
 0x258   : > { %v440_v53 = vmul.f32 %v1000_v52, %v1204_v26 }
 0x25a   : > { %916 = vmatmul.mubr.f32.vlgmr.msra.gmra.mxu1 %v440_v53 }
 0x31a   : > { %v530_v55 = vpop.f32.mrf.mxu1 }
 0x31b   : > { %v531_v56 = vadd.f32 %v815_v54, %v530_v55  ;;  %v818_v55 = vsel %vm681_vm12, 1.0, %v1081_v4 }
 0x31c   : > { %v917_v57 = vpop.f32.mrf.mxu1 }
 0x31d   : > { %v1275_v58 = vmax.f32 %v531_v56, 0.0 }
 0x31f   : > { %v535_v59 = vmul.f32 %v1275_v58, %v1275_v58 }
 0x321   : > { %536 = vadd.xlane.f32.xlu1 %v535_v59 }
 0x3aa   : > { %v537_v13 = vpop.xlane.xlu1 %536 }
 0x3ab   : > { %v538_v14 = vmul.f32 0.03125, %v537_v13 }
 0x3ad   : > { %1001 = vrsqrt.f32 %v538_v14  ;;  %vm541_vm6 = vcmp.eq.f32.partialorder %v538_v14, inf  ;;  %v544_v17 = vand.u32 2147483648, %v538_v14  ;;  %vm543_vm7 = vcmp.eq.f32.partialorder %v538_v14, 0.0 }
 0x3ba   : > { %v1002_v15 = vpop.eup %1001 }
 0x3bb   : > { %v540_v16 = vmul.f32 %v1002_v15, %v538_v14 }
 0x3bd   : > { %v542_v18 = vsel %vm541_vm6, %v538_v14, %v540_v16 }
 0x3be   : > { %v545_v19 = vsel %vm543_vm7, %v544_v17, %v542_v18 }
 0x3bf   : > { %v546_v20 = vadd.f32 1e-08, %v545_v19 }
 0x3c1   : > { %1003 = vrcp.f32 %v546_v20 }
 0x3ce   : > { %v1004_v21 = vpop.eup %1003 }
 0x3cf   : > { %v548_v22 = vmul.f32 %v1004_v21, %v1275_v58 }
 0x3d1   : > { %951 = vmatmul.mubr.f32.vlgmr.msra.gmra.mxu0 %v548_v22 }
 0x491   : > { %v631_v26 = vpop.f32.mrf.mxu0 }
 0x492   : > { %v638_v27 = vsel %vm637_vm8, %v631_v26, -1e+30 }
 0x493   : > { %639 = vmax.xlane.f32.xlu1 %v638_v27  ;;  %v952_v28 = vpop.f32.mrf.mxu0 }
 0x4a4   : > { %650 = vperm.xlu1 %991, %v648_v29  }
 0x51c   : > { %v640_v30 = vpop.xlane.xlu1 %639 }
 0x51d   : > { %v641_v31 = vsub.f32 %v638_v27, %v640_v30 }
 0x51f   : > { %v642_v32 = vmul.f32 1.442695, %v641_v31  ;;  %vm657_vm9 = vcmp.ge.f32.partialorder %v641_v31, 0.0 }
 0x520   : > { %v658_v33 = vsel %vm657_vm9, %v1295_v25, 128  ;;  %v651_v38 = vpop.permute.xlu1 %650 }
 0x521   : > { %1005 = vpow2.f32 %v642_v32  ;;  %v660_v34 = vshra.s32 %v658_v33, 16  ;;  %v659_v37 = vand.u32 65535, %v658_v33  ;;  %vm652_vm11 = vcmp.eq.s32.totalorder %v1295_v25, %v651_v38 }
 0x522   : > { %v653_v42 = vsel %vm652_vm11, %v641_v31, 0.0 }
 0x523   : > { %v662_v35 = vcvt.s32.f32 %v660_v34  ;;  %v661_v40 = vcvt.s32.f32 %v659_v37 }
 0x525   : > { %663 = vmin.xlane.f32.xlu0 %v662_v35 }
 0x52e   : > { %v1006_v36 = vpop.eup %1005 }
 0x52f   : > { %644 = vadd.xlane.f32.xlu0 %v1006_v36 }
 0x5ae   : > { %v664_v39 = vpop.xlane.xlu0 %663 }
 0x5af   : > { %vm665_vm10 = vcmp.eq.f32.partialorder %v662_v35, %v664_v39  ;;  %v670_v46 = vcvt.f32.s32 %v664_v39 }
 0x5b0   : > { %v666_v41 = vsel %vm665_vm10, %v661_v40, inf }
 0x5b1   : > { %667 = vmin.xlane.f32.xlu0 %v666_v41  ;;  %v671_v50 = vshll.u32 %v670_v46, 16 }
 0x5b5   : > { %654 = vadd.xlane.f32.xlu0 %v653_v42 }
 0x5b8   : > { %v645_v43 = vpop.xlane.xlu0 %644 }
 0x5b9   : > { %1007 = vlog2.f32 %v645_v43 }
 0x5c6   : > { %v1008_v48 = vpop.eup %1007 }
 0x5c7   : > { %v647_v53 = vmul.f32 0.6931472, %v1008_v48 }
 0x63a   : > { %v668_v49 = vpop.xlane.xlu0 %667 }
 0x63b   : > { %v669_v51 = vcvt.f32.s32 %v668_v49 }
 0x63d   : > { %v672_v52 = vadd.s32 %v671_v50, %v669_v51 }
 0x63e   : > { %v655_v54 = vpop.xlane.xlu0 %654 }
 0x63f   : > { %v656_v56 = vsub.f32 %v647_v53, %v655_v54  ;;  %vm673_vm13 = vcmp.eq.s32.totalorder %v672_v52, %v648_v29 }
 0x640   : > { %v816_v57 = vsel %vm673_vm13, 1.0, %v1081_v4 }
 0x641   : > { %v696_v58 = vmul.f32 %v818_v55, %v816_v57  ;;  %v684_v59 = vmul.f32 %v818_v55, %v656_v56 }
 0x643   : > { %v697_v60 = vsel %vm685_vm14, %v696_v58, 0.0  ;;  %v686_v61 = vsel %vm685_vm14, %v684_v59, 0.0 }
 0x644   : > { %698 = vadd.xlane.f32.xlu1 %v697_v60  ;;  %687 = vadd.xlane.f32.xlu0 %v686_v61 }
 0x6cd   : > { %v688_v62 = vpop.xlane.xlu0 %687  ;;  %v699_v63 = vpop.xlane.xlu1 %698 }
 0x6ce   : > { %v689_v0 = vrot.slane %v688_v62, 4  ;;  %v700_v1 = vrot.slane %v699_v63, 4 }
 0x6d0   : > { %v690_v2 = vadd.f32 %v689_v0, %v688_v62  ;;  %v701_v3 = vadd.f32 %v700_v1, %v699_v63 }
 0x6d2   : > { %v691_v5 = vrot.slane %v690_v2, 2  ;;  %v702_v6 = vrot.slane %v701_v3, 2 }
 0x6d4   : > { %v703_v7 = vadd.f32 %v702_v6, %v701_v3  ;;  %v692_v8 = vadd.f32 %v691_v5, %v690_v2 }
 0x6d6   : > { %v693_v9 = vrot.slane %v692_v8, 1  ;;  %v704_v4 = vrot.slane %v703_v7, 1 }
 0x6d8   : > { %v694_v10 = vadd.f32 %v693_v9, %v692_v8  ;;  %v705_v11 = vadd.f32 %v704_v4, %v703_v7 }
 0x6da   : > { %953 = vpush %v694_v10 }
 0x6db   : > { %955 = vpush %v705_v11 }
 0x70b   : > { %s954_s25 = spop %953 }
 0x70c   : > { %v711_v12 = vstv %s954_s25  ;;  %s956_s22 = spop %955 }
 0x70d   : > { %v709_v13 = vstv %s956_s22 }
 0x70e   : > { %v710_v14 = vsel %vm708_vm15, %v709_v13, 0.0 }
 0x70f   : > { %v712_v15 = vsel %vm707_vm0, %v711_v12, %v710_v14 }
 0x710   : > { %713 = vst [vmem:[%s320_s27] sm:$0xff] %v712_v15 }
 0x711 PF: > { %s19_s24 = sadd.s32 1, %s1075_s24  }
 0x712   : > { %p16_p2 = scmp.ge.s32.totalorder %s19_s24, 5  }
 0x714   :  { %18 = sbr.rel (!%p16_p2) target bundleno = 2 (0x2), region = 90 }
 0x719   :  { %733 = vsyncpa [#allocation3], 1 }
 0x71a   :  { %735 = vsyncpa [#allocation3 + $0x1], 1 }
 0x71b   :  { %736 = vsyncpa [#allocation5], 1 }

</bundles_post_ra>
